<compile_context>
chip_gen: v7x
topology: tpu7x:2x2x1
jax: 0.10.0
libtpu: 0.0.40
codegen_flags: <defaults>
</compile_context>

<pallas_src>
import functools
import math

import jax
import jax.numpy as jnp
from jax.experimental import pallas as pl
from jax.experimental.pallas import tpu as pltpu


# ----------------------------------------------------------------------------
# tiling / VMEM helpers
# ----------------------------------------------------------------------------
def _choose_tile(n, max_tile, align):
    """Return (tile, padded_n).

    tile == n when n <= max_tile (block == full dim, always legal).
    Otherwise prefer the largest `align`-multiple divisor of n that is
    <= max_tile; if none exists, pad n up to a multiple of an aligned tile so
    we never fall back to a full-dimension (VMEM-OOM risk) block.
    """
    if n <= max_tile:
        return n, n
    t = (max_tile // align) * align
    tt = t
    while tt >= align:
        if n % tt == 0:
            return tt, n
        tt -= align
    padded = ((n + t - 1) // t) * t
    return t, padded


def _pad_axis(x, axis, target):
    if x.shape[axis] == target:
        return x
    pad = [(0, 0)] * x.ndim
    pad[axis] = (0, target - x.shape[axis])
    return jnp.pad(x, pad)


def _mosaic_params(dimension_semantics, tile_bytes):
    """CompilerParams with an explicit tile-derived VMEM limit (double-buffer
    headroom). Floor 16 MiB (<= every generation's scoped default), cap 48 MiB
    so it stays inside v7x's 64 MiB physical VMEM."""
    limit = max(16 << 20, min(48 << 20, int(2 * tile_bytes) + (8 << 20)))
    return pltpu.CompilerParams(dimension_semantics=dimension_semantics,
                                vmem_limit_bytes=limit)


# ----------------------------------------------------------------------------
# Kernel 1: learnable positional encoding add (dropout is identity in eval)
# ----------------------------------------------------------------------------
def _add_pe_kernel(x_ref, pe_ref, o_ref):
    o_ref[...] = (x_ref[...].astype(jnp.float32)
                  + pe_ref[...].astype(jnp.float32)).astype(o_ref.dtype)


def add_positional_encoding(x, pe_rows):
    """x: (B, S, D); pe_rows: (S, D). Lane-dense flattened (S*D) tiling; the PE
    tile index lives on the outer grid axis so it is reused across batch."""
    B, S, D = x.shape
    N = S * D
    T, Np = _choose_tile(N, 1 << 18, 128)        # ~1 MiB f32 tiles
    xf = _pad_axis(x.reshape(B, 1, N), 2, Np)
    pef = _pad_axis(pe_rows.reshape(1, 1, N), 2, Np)
    # TODO(synk): training-mode dropout would multiply by an externally sampled
    # keep-mask; eval mode is the identity so no RNG kernel is emitted.
    out = pl.pallas_call(
        _add_pe_kernel,
        out_shape=jax.ShapeDtypeStruct((B, 1, Np), x.dtype),
        grid=(Np // T, B),
        in_specs=[
            pl.BlockSpec((1, 1, T), lambda n, b: (b, 0, n)),
            pl.BlockSpec((1, 1, T), lambda n, b: (0, 0, n)),
        ],
        out_specs=pl.BlockSpec((1, 1, T), lambda n, b: (b, 0, n)),
        compiler_params=_mosaic_params(("parallel", "parallel"),
                                       3 * T * x.dtype.itemsize),
    )(xf, pef)
    if Np != N:
        out = out[:, :, :N]
    return out.reshape(B, S, D)


# ----------------------------------------------------------------------------
# Kernel 2: tiled matmul + bias (+ optional fused ReLU) for all Linear layers
# ----------------------------------------------------------------------------
def _matmul_kernel(x_ref, w_ref, b_ref, o_ref, acc_ref, *, relu):
    @pl.when(pl.program_id(2) == 0)
    def _init():
        acc_ref[...] = jnp.zeros_like(acc_ref)

    acc_ref[...] += jnp.dot(x_ref[...], w_ref[...],
                            preferred_element_type=jnp.float32)

    @pl.when(pl.program_id(2) == pl.num_programs(2) - 1)
    def _finish():
        y = acc_ref[...] + b_ref[...].astype(jnp.float32)
        if relu:
            y = jnp.maximum(y, 0.0)
        o_ref[...] = y.astype(o_ref.dtype)


def linear(x, w, b, *, relu=False, tm_target=256, tk_target=512, tn_target=512):
    """x: (M, K) @ w: (K, N) + b: (N,), optional fused ReLU. Inputs are padded
    to aligned tiles when no aligned divisor exists (keeps stores lane-dense
    and tile VMEM bounded even for odd vocab sizes)."""
    M, K = x.shape
    Kw, N = w.shape
    assert K == Kw
    tm, Mp = _choose_tile(M, tm_target, 8)
    tk, Kp = _choose_tile(K, tk_target, 128)
    tn, Np = _choose_tile(N, tn_target, 128)
    xp = _pad_axis(_pad_axis(x, 0, Mp), 1, Kp)
    wp = _pad_axis(_pad_axis(w, 0, Kp), 1, Np)
    bp = _pad_axis(b.reshape(1, N), 1, Np)
    itm = x.dtype.itemsize
    tile_bytes = (tm * tk + tk * tn + tn + tm * tn) * itm + tm * tn * 4
    out = pl.pallas_call(
        functools.partial(_matmul_kernel, relu=relu),
        out_shape=jax.ShapeDtypeStruct((Mp, Np), x.dtype),
        grid=(Mp // tm, Np // tn, Kp // tk),
        in_specs=[
            pl.BlockSpec((tm, tk), lambda i, j, k: (i, k)),
            pl.BlockSpec((tk, tn), lambda i, j, k: (k, j)),
            pl.BlockSpec((1, tn), lambda i, j, k: (0, j)),
        ],
        out_specs=pl.BlockSpec((tm, tn), lambda i, j, k: (i, j)),
        scratch_shapes=[pltpu.VMEM((tm, tn), jnp.float32)],
        compiler_params=_mosaic_params(("parallel", "parallel", "arbitrary"),
                                       tile_bytes),
    )(xp, wp, bp)
    if Mp != M or Np != N:
        out = out[:M, :N]
    return out


# ----------------------------------------------------------------------------
# Kernel 3: multi-head attention, all heads of one batch per grid step,
#           merged lane-dense (Sq, E) output, bias built in-kernel.
# ----------------------------------------------------------------------------
def _attn_body(q, k, v, bias, o_ref, *, n_heads, scale):
    """q: (Sq, E), k/v: (Sk, E), bias: (Sq, Sk) additive or None."""
    sq, e = q.shape
    dh = e // n_heads
    outs = []
    for h in range(n_heads):                       # static unroll over heads
        qh = q[:, h * dh:(h + 1) * dh]
        kh = k[:, h * dh:(h + 1) * dh]
        vh = v[:, h * dh:(h + 1) * dh]
        s = jax.lax.dot_general(qh, kh, (((1,), (1,)), ((), ())),
                                preferred_element_type=jnp.float32) * scale
        if bias is not None:
            s = s + bias
        m = jnp.max(s, axis=-1, keepdims=True)
        p = jnp.exp(s - m)
        p = p / jnp.sum(p, axis=-1, keepdims=True)
        outs.append(jnp.dot(p, vh, preferred_element_type=jnp.float32))
    o_ref[...] = jnp.concatenate(outs, axis=-1).astype(o_ref.dtype)


def _self_attn_kernel(q_ref, k_ref, v_ref, causal_ref, pad_ref, o_ref, *,
                      n_heads, scale):
    bias = (causal_ref[...].astype(jnp.float32)
            + pad_ref[...].astype(jnp.float32))          # (Sq,Sk) + (1,Sk)
    _attn_body(q_ref[...].astype(jnp.float32), k_ref[...].astype(jnp.float32),
               v_ref[...].astype(jnp.float32), bias, o_ref,
               n_heads=n_heads, scale=scale)


def _cross_attn_kernel(q_ref, k_ref, v_ref, o_ref, *, n_heads, scale):
    _attn_body(q_ref[...].astype(jnp.float32), k_ref[...].astype(jnp.float32),
               v_ref[...].astype(jnp.float32), None, o_ref,
               n_heads=n_heads, scale=scale)


def _attention_call(kernel, q, k, v, extra_inputs, extra_specs, *, n_heads, scale):
    B, Sq, E = q.shape
    Sk = k.shape[1]
    # TODO(synk): whole Sq x Sk score tile lives in VMEM; long sequences need a
    # KV-tiled online-softmax (flash) variant, especially on v7x (64 MiB VMEM).
    q_spec = pl.BlockSpec((pl.Squeezed(), Sq, E), lambda b: (b, 0, 0))
    kv_spec = pl.BlockSpec((pl.Squeezed(), Sk, E), lambda b: (b, 0, 0))
    tile_bytes = (2 * Sq * E + 4 * Sk * E + 2 * Sq * Sk + Sk) * 4
    return pl.pallas_call(
        functools.partial(kernel, n_heads=n_heads, scale=scale),
        out_shape=jax.ShapeDtypeStruct((B, Sq, E), q.dtype),
        grid=(B,),
        in_specs=[q_spec, kv_spec, kv_spec] + extra_specs,
        out_specs=pl.BlockSpec((pl.Squeezed(), Sq, E), lambda b: (b, 0, 0)),
        compiler_params=_mosaic_params(("parallel",), tile_bytes),
    )(q, k, v, *extra_inputs)


def self_attention(q, k, v, causal, pad_bias, *, n_heads, scale):
    """q,k,v: (B, S, E); causal: (S, S) shared; pad_bias: (B, 1, S)."""
    Sq, Sk = causal.shape
    extra_specs = [
        pl.BlockSpec((Sq, Sk), lambda b: (0, 0)),                    # shared
        pl.BlockSpec((pl.Squeezed(), 1, Sk), lambda b: (b, 0, 0)),   # per-batch row
    ]
    return _attention_call(_self_attn_kernel, q, k, v, (causal, pad_bias),
                           extra_specs, n_heads=n_heads, scale=scale)


def cross_attention(q, k, v, *, n_heads, scale):
    """Memory masks are None in the PyTorch forward -> bias-free kernel."""
    return _attention_call(_cross_attn_kernel, q, k, v, (), [],
                           n_heads=n_heads, scale=scale)


# ----------------------------------------------------------------------------
# Kernel 4: fused residual add + LayerNorm over the feature axis
# ----------------------------------------------------------------------------
def _ln_residual_kernel(x_ref, r_ref, g_ref, b_ref, o_ref, *, eps):
    x = x_ref[...].astype(jnp.float32) + r_ref[...].astype(jnp.float32)
    mu = jnp.mean(x, axis=-1, keepdims=True)
    xc = x - mu
    var = jnp.mean(xc * xc, axis=-1, keepdims=True)
    inv = jax.lax.rsqrt(var + eps)
    y = xc * inv * g_ref[...].astype(jnp.float32) + b_ref[...].astype(jnp.float32)
    o_ref[...] = y.astype(o_ref.dtype)


def layer_norm_residual(x2d, r2d, gamma, beta, *, eps=1e-5):
    """LayerNorm(x2d + r2d) * gamma + beta, row-tiled and VMEM-capped."""
    M, D = x2d.shape
    row_cap = max(8, (8 << 20) // max(1, D * 4 * 6))   # keep ~6 live f32 (tm, D) bufs < 8 MiB
    tm, Mp = _choose_tile(M, min(1024, row_cap), 8)
    xp = _pad_axis(x2d, 0, Mp)
    rp = _pad_axis(r2d, 0, Mp)
    tile_bytes = (3 * tm * D + 2 * D) * 4
    out = pl.pallas_call(
        functools.partial(_ln_residual_kernel, eps=eps),
        out_shape=jax.ShapeDtypeStruct((Mp, D), x2d.dtype),
        grid=(Mp // tm,),
        in_specs=[
            pl.BlockSpec((tm, D), lambda i: (i, 0)),
            pl.BlockSpec((tm, D), lambda i: (i, 0)),
            pl.BlockSpec((1, D), lambda i: (0, 0)),
            pl.BlockSpec((1, D), lambda i: (0, 0)),
        ],
        out_specs=pl.BlockSpec((tm, D), lambda i: (i, 0)),
        compiler_params=_mosaic_params(("parallel",), tile_bytes),
    )(xp, rp, gamma.reshape(1, D), beta.reshape(1, D))
    if Mp != M:
        out = out[:M]
    return out


# ----------------------------------------------------------------------------
# Model assembly (eval mode: all dropouts are identity)
# ----------------------------------------------------------------------------
def self_mha(x, p, causal, pad_bias, n_heads):
    B, S, E = x.shape
    qkv = linear(x.reshape(B * S, E), p["w_qkv"], p["b_qkv"])       # fused Q|K|V
    q = qkv[:, :E].reshape(B, S, E)
    k = qkv[:, E:2 * E].reshape(B, S, E)
    v = qkv[:, 2 * E:].reshape(B, S, E)
    scale = 1.0 / math.sqrt(E // n_heads)
    o = self_attention(q, k, v, causal, pad_bias, n_heads=n_heads, scale=scale)
    return linear(o.reshape(B * S, E), p["wo"], p["bo"]).reshape(B, S, E)


def cross_mha(x_q, memory, p, n_heads):
    B, Sq, E = x_q.shape
    Sk = memory.shape[1]
    q = linear(x_q.reshape(B * Sq, E), p["wq"], p["bq"]).reshape(B, Sq, E)
    kv = linear(memory.reshape(B * Sk, E), p["w_kv"], p["b_kv"])    # fused K|V
    k = kv[:, :E].reshape(B, Sk, E)
    v = kv[:, E:].reshape(B, Sk, E)
    scale = 1.0 / math.sqrt(E // n_heads)
    o = cross_attention(q, k, v, n_heads=n_heads, scale=scale)
    return linear(o.reshape(B * Sq, E), p["wo"], p["bo"]).reshape(B, Sq, E)


def decoder_layer(h, memory, p, causal, pad_bias, n_heads):
    B, S, E = h.shape
    sa = self_mha(h, p["self_attn"], causal, pad_bias, n_heads)
    h = layer_norm_residual(h.reshape(B * S, E), sa.reshape(B * S, E),
                            p["ln1_g"], p["ln1_b"]).reshape(B, S, E)
    ca = cross_mha(h, memory, p["cross_attn"], n_heads)
    h = layer_norm_residual(h.reshape(B * S, E), ca.reshape(B * S, E),
                            p["ln2_g"], p["ln2_b"]).reshape(B, S, E)
    f = linear(h.reshape(B * S, E), p["w1"], p["b1"], relu=True)
    f = linear(f, p["w2"], p["b2"])
    h = layer_norm_residual(h.reshape(B * S, E), f,
                            p["ln3_g"], p["ln3_b"]).reshape(B, S, E)
    return h


def transformer_decoder_forward(params, token_ids, *, n_heads, training=False):
    B, S = token_ids.shape
    E = params["tok_emb"].shape[1]

    # bias pieces exactly as in the PyTorch forward, never materialized (B,S,S):
    causal = jnp.triu(jnp.full((S, S), -1e9, jnp.float32), k=1)            # (S, S)
    pad_bias = jnp.where(token_ids == 0, -1e9, 0.0).astype(jnp.float32)    # (B, S)
    pad_bias = pad_bias.reshape(B, 1, S)                                   # (B, 1, S)

    # TODO(synk): token-id embedding is a data-dependent row gather; left as
    # plain-JAX glue rather than a per-row DMA gather kernel.
    h = params["tok_emb"][token_ids]                                       # (B, S, E)
    h = add_positional_encoding(h, params["pos_emb"][:S])                  # Pallas
    memory = h
    for lp in params["layers"]:
        h = decoder_layer(h, memory, lp, causal, pad_bias, n_heads)

    if training:
        logits = linear(h.reshape(B * S, E), params["w_out"], params["b_out"])
        return logits.reshape(B, S, -1)
    # eval mode: slice the last token BEFORE the vocab projection (S x cheaper)
    return linear(h[:, -1, :], params["w_out"], params["b_out"])           # (B, vocab)


# ----------------------------------------------------------------------------
# Parameter init (deterministic; torch weights are not loaded)
# ----------------------------------------------------------------------------
def init_params(key, *, vocab_size, embed_size, hidden_size, num_layers, max_len):
    k_tok, k_pos, k_out, k_layers = jax.random.split(key, 4)

    def dense(k, fan_in, fan_out):
        kw, kb = jax.random.split(k)
        lim = 1.0 / math.sqrt(fan_in)
        w = jax.random.uniform(kw, (fan_in, fan_out), jnp.float32, -lim, lim)
        b = jax.random.uniform(kb, (fan_out,), jnp.float32, -lim, lim)
        return w, b

    def self_attn_params(k):
        k1, k2 = jax.random.split(k)
        w_qkv, b_qkv = dense(k1, embed_size, 3 * embed_size)    # fused Q|K|V
        wo, bo = dense(k2, embed_size, embed_size)
        return dict(w_qkv=w_qkv, b_qkv=b_qkv, wo=wo, bo=bo)

    def cross_attn_params(k):
        k1, k2, k3 = jax.random.split(k, 3)
        wq, bq = dense(k1, embed_size, embed_size)
        w_kv, b_kv = dense(k2, embed_size, 2 * embed_size)      # fused K|V
        wo, bo = dense(k3, embed_size, embed_size)
        return dict(wq=wq, bq=bq, w_kv=w_kv, b_kv=b_kv, wo=wo, bo=bo)

    def layer_params(k):
        ka, kc, k1, k2 = jax.random.split(k, 4)
        w1, b1 = dense(k1, embed_size, hidden_size)
        w2, b2 = dense(k2, hidden_size, embed_size)
        ones = jnp.ones((embed_size,), jnp.float32)
        zeros = jnp.zeros((embed_size,), jnp.float32)
        return dict(self_attn=self_attn_params(ka), cross_attn=cross_attn_params(kc),
                    w1=w1, b1=b1, w2=w2, b2=b2,
                    ln1_g=ones, ln1_b=zeros, ln2_g=ones, ln2_b=zeros,
                    ln3_g=ones, ln3_b=zeros)

    w_out, b_out = dense(k_out, embed_size, vocab_size)
    return dict(
        tok_emb=0.02 * jax.random.normal(k_tok, (vocab_size, embed_size), jnp.float32),
        pos_emb=0.02 * jax.random.normal(k_pos, (max_len, embed_size), jnp.float32),
        layers=[layer_params(k) for k in jax.random.split(k_layers, num_layers)],
        w_out=w_out, b_out=b_out,
    )


# ----------------------------------------------------------------------------
# Pure-JAX reference (same math) for a correctness check
# ----------------------------------------------------------------------------
def _ref_forward(params, token_ids, *, n_heads, training=False):
    B, S = token_ids.shape
    E = params["tok_emb"].shape[1]
    causal = jnp.triu(jnp.full((S, S), -1e9, jnp.float32), k=1)
    pad = jnp.where(token_ids == 0, -1e9, 0.0).astype(jnp.float32)
    self_bias = causal[None] + pad[:, None, :]

    def ln(x, g, b, eps=1e-5):
        mu = x.mean(-1, keepdims=True)
        var = ((x - mu) ** 2).mean(-1, keepdims=True)
        return (x - mu) / jnp.sqrt(var + eps) * g + b

    def mha(xq, xkv, wq, bq, wk, bk, wv, bv, wo, bo, bias):
        dh = E // n_heads
        q = (xq @ wq + bq).reshape(B, -1, n_heads, dh).transpose(0, 2, 1, 3)
        k = (xkv @ wk + bk).reshape(B, -1, n_heads, dh).transpose(0, 2, 1, 3)
        v = (xkv @ wv + bv).reshape(B, -1, n_heads, dh).transpose(0, 2, 1, 3)
        s = jnp.einsum("bhqd,bhkd->bhqk", q, k) / math.sqrt(dh)
        if bias is not None:
            s = s + bias[:, None]
        a = jax.nn.softmax(s, axis=-1)
        o = jnp.einsum("bhqk,bhkd->bhqd", a, v).transpose(0, 2, 1, 3).reshape(B, -1, E)
        return o @ wo + bo

    h = params["tok_emb"][token_ids] + params["pos_emb"][:S][None]
    memory = h
    for lp in params["layers"]:
        sp = lp["self_attn"]
        wq, wk, wv = jnp.split(sp["w_qkv"], 3, axis=1)
        bq, bk, bv = jnp.split(sp["b_qkv"], 3)
        h = ln(h + mha(h, h, wq, bq, wk, bk, wv, bv, sp["wo"], sp["bo"], self_bias),
               lp["ln1_g"], lp["ln1_b"])
        cp = lp["cross_attn"]
        wk2, wv2 = jnp.split(cp["w_kv"], 2, axis=1)
        bk2, bv2 = jnp.split(cp["b_kv"], 2)
        h = ln(h + mha(h, memory, cp["wq"], cp["bq"], wk2, bk2, wv2, bv2,
                       cp["wo"], cp["bo"], None),
               lp["ln2_g"], lp["ln2_b"])
        f = jnp.maximum(h @ lp["w1"] + lp["b1"], 0.0) @ lp["w2"] + lp["b2"]
        h = ln(h + f, lp["ln3_g"], lp["ln3_b"])
    out = h @ params["w_out"] + params["b_out"]
    if not training:
        out = out[:, -1, :]
    return out


if __name__ == "__main__":
    VOCAB, EMBED, HIDDEN, LAYERS, HEADS = 50, 32, 64, 2, 8
    B, S = 2, 8

    root = jax.random.PRNGKey(0)
    k_params, k_ids = jax.random.split(root)
    params = init_params(k_params, vocab_size=VOCAB, embed_size=EMBED,
                         hidden_size=HIDDEN, num_layers=LAYERS, max_len=64)
    token_ids = jax.random.randint(k_ids, (B, S), 1, VOCAB, dtype=jnp.int32)
    token_ids = token_ids.at[:, -1].set(0)   # exercise the key-padding-mask path

    out = transformer_decoder_forward(params, token_ids, n_heads=HEADS)
    out = jax.block_until_ready(out)

    ref = _ref_forward(params, token_ids, n_heads=HEADS)
    assert out.shape == (B, VOCAB)
    assert bool(jnp.all(jnp.isfinite(out)))
    assert bool(jnp.allclose(out, ref, atol=2e-2, rtol=2e-2)), "mismatch vs pure-JAX reference"

    print("KERNEL_OK")
</pallas_src>

<mosaic_0001>
module attributes {stable_mosaic.version = 11 : i64} {
  func.func @_add_pe_kernel(%arg0: i32, %arg1: i32, %arg2: memref<1x1x256xf32, #tpu.memory_space<vmem>>, %arg3: memref<1x1x256xf32, #tpu.memory_space<vmem>>, %arg4: memref<1x1x256xf32, #tpu.memory_space<vmem>>) attributes {dimension_semantics = [#tpu.dimension_semantics<parallel>, #tpu.dimension_semantics<parallel>], iteration_bounds = array<i64: 1, 2>, scalar_prefetch = 0 : i64, scratch_operands = 0 : i64, tpu.core_type = #tpu.core_type<tc>, window_params = [{transform_indices = @transform_0, window_bounds = array<i64: 1, 1, 256>}, {transform_indices = @transform_1, window_bounds = array<i64: 1, 1, 256>}, {transform_indices = @transform_2, window_bounds = array<i64: 1, 1, 256>}]} {
    %c0 = arith.constant 0 : index
    %c0_0 = arith.constant 0 : index
    %c0_1 = arith.constant 0 : index
    %0 = vector.load %arg2[%c0, %c0_0, %c0_1] : memref<1x1x256xf32, #tpu.memory_space<vmem>>, vector<1x1x256xf32>
    %c0_2 = arith.constant 0 : index
    %c0_3 = arith.constant 0 : index
    %c0_4 = arith.constant 0 : index
    %1 = vector.load %arg3[%c0_2, %c0_3, %c0_4] : memref<1x1x256xf32, #tpu.memory_space<vmem>>, vector<1x1x256xf32>
    %2 = arith.addf %0, %1 : vector<1x1x256xf32>
    %c0_5 = arith.constant 0 : index
    %c0_6 = arith.constant 0 : index
    %c0_7 = arith.constant 0 : index
    %3 = vector.load %arg4[%c0_5, %c0_6, %c0_7] : memref<1x1x256xf32, #tpu.memory_space<vmem>>, vector<1x1x256xf32>
    tpu.vector_store %arg4[%c0_5, %c0_6, %c0_7], %2 {strides = array<i32>} : memref<1x1x256xf32, #tpu.memory_space<vmem>>, vector<1x1x256xf32>,
    return
  }
  func.func @transform_0(%arg0: i32, %arg1: i32) -> (i32, i32, i32) {
    %c0_i32 = arith.constant 0 : i32
    %c0_i32_0 = arith.constant 0 : i32
    return %arg1, %c0_i32, %arg0 : i32, i32, i32
  }
  func.func @transform_1(%arg0: i32, %arg1: i32) -> (i32, i32, i32) {
    %c0_i32 = arith.constant 0 : i32
    %c0_i32_0 = arith.constant 0 : i32
    %c0_i32_1 = arith.constant 0 : i32
    return %c0_i32, %c0_i32_0, %arg0 : i32, i32, i32
  }
  func.func @transform_2(%arg0: i32, %arg1: i32) -> (i32, i32, i32) {
    %c0_i32 = arith.constant 0 : i32
    %c0_i32_0 = arith.constant 0 : i32
    return %arg1, %c0_i32, %arg0 : i32, i32, i32
  }
}

</mosaic_0001>

<bundles_post_ra>
// kernel: tpu_custom_call.1
= control target key start
LH: loop header
LB: loop body
LE: loop exit
PB: predicated region body
PF: predicated region fallthrough
CT: control target
= control target key end

     0   :  { %7 = vsyncpa [#allocation3], 0  ;;  %s706_s0 = inlined_call_operand.hbm [shape: f32[2,1,256], index: 0, kind: input, shape index: {}]   ;;  %s707_s1 = inlined_call_operand.vmem [shape: f32[1,1,256], index: 1, kind: input, shape index: {}]   ;;  %s708_s2 = inlined_call_operand.hbm [shape: f32[2,1,256], index: 2, kind: output, shape index: {}]  }
   0x1   :  { %9 = vsyncpa [#allocation3 + $0x1], 0 }
   0x2   :  { %10 = vsyncpa [#allocation4], 0 }
   0x3   :  { %12 = vsyncpa [#allocation4 + $0x1], 0  ;;  %s531_s9 = smov 0   ;;  %s533_s10 = smov 0  }
   0x4   :  { %s535_s11 = smov 0   ;;  %s537_s12 = smov 0  }
   0x5   :  { %s539_s13 = smov 0   ;;  %s541_s14 = smov 0  }
   0x6 LB: > { %s320_s15 = sadd.s32 4294967295, %s512_s14   ;;  %s321_s16 = sadd.s32 4294967294, %s512_s14   ;;  %s512_s14 = sphi %s541_s14, %s18_s14   ;;  %s508_s13 = sphi %s539_s13, %s724_s13   ;;  %s504_s12 = sphi %s537_s12, %s723_s12   ;;  %s500_s11 = sphi %s535_s11, %s722_s11   ;;  %s496_s10 = sphi %s533_s10, %s721_s10   ;;  %s492_s9 = sphi %s531_s9, %s720_s9  }
   0x7   : > { %s27_s17 = sadd.s32 1, %s508_s13  ;;  %s39_s18 = sadd.s32 1, %s500_s11 }
   0x8   : > { %p28_p0 = scmp.ge.s32.totalorder %s27_s17, 2  ;;  %p46_p1 = scmp.ne.s32.totalorder %s500_s11, %s496_s10 }
   0x9   : > { %p47_p2 = scmp.eq.s32.totalorder %s512_s14, 0  ;;  %p52_p3 = scmp.ne.s32.totalorder %s496_s10, %s492_s9 }
   0xa   : > { %s726_s17 = smov (%p28_p0, %s27_s17), 0  ;;  %p53_p5 = scmp.eq.s32.totalorder %s320_s15, 0 }
   0xb   : > { %p572_p4 = por %p47_p2, %p46_p1  ;;  %s34_s20 = ssub.s32 %s508_s13, %s726_s17 }
   0xc   : > { %p104_p6 = scmp.eq.s32.totalorder %s320_s15, 1  ;;  %p37_p7 = scmp.eq.s32.totalorder %s34_s20, 0 }
   0xd   : > { %p578_p8 = por %p53_p5, %p52_p3  ;;  %p110_p10 = scmp.eq.s32.totalorder %s321_s16, 1 }
   0xe   : > { %p582_p9 = por %p104_p6, %p46_p1  ;;  %p350_p13 = scmp.lt.s32.totalorder %s512_s14, 2 }
   0xf   : > { %s587_s23 = scalar_select %p37_p7, %s500_s11, %s39_s18  }
  0x10   : > { %s712_s22 = scalar_select %p582_p9, 1, 0 }
  0x11   : > { %p589_p11 = por %p110_p10, %p52_p3  ;;  %s138_s25 = sand.u32 1, %s500_s11  }
  0x12   : > { %s325_s26 = sshll.u32 %s138_s25, 1  ;;  %s336_s27 = sshll.u32 %s508_s13, 5 }
  0x13   : > { %s713_s24 = scalar_select %p589_p11, 1, 0 }
  0x14   : > { %s600_s30 = scalar_lea.hbm %s706_s0, %s336_s27  ;;  %s142_s3 = scalar_lea.vmem [#allocation2], %s325_s26 }
  0x15   : > { %s152_s4 = sshll.u32 %s142_s3, 4  ;;  %p606_p0 = pnand %p350_p13, %p572_p4  ;;  %s602_s4 = int_to_ptr.vmem [resolvable:$true] %s152_s4 }
  0x16   : > { %s139_s6 = scalar_lea.sflag [#allocation3], %s138_s25  ;;  %s400_s7 = scalar_lea.hbm %s600_s30, 32 }
  0x17   : > { %p401_p3 = scmp.ne.s32.totalorder %s600_s30, %s400_s7  ;;  %p402_p5 = pneg %p606_p0 }
  0x18   : > { %s405_s16 = scalar_lea.hbm %s706_s0, 64  ;;  %p406_p4 = scmp.lt.u32.totalorder %s600_s30, %s706_s0 }
  0x19   : > { %p403_p6 = pnand %p402_p5, %p401_p3  ;;  %p407_p10 = scmp.lt.u32.totalorder %s405_s16, %s400_s7 }
  0x1a   : > { %p409_p12 = scmp.lt.u32.totalorder %s400_s7, %s600_s30 }
  0x1b   : > { %p404_p7 = pneg %p403_p6  ;;  %p408_p13 = por %p407_p10, %p406_p4 }
  0x1d   : > { %p410_p1 = por %p409_p12, %p408_p13 }
  0x1f   : > { %p411_p2 = pnand %p410_p1, %p404_p7 }
  0x21   : > { %414 = shalt.err (!%p411_p2)
}
  0x22   : > { %s415_s20 = scalar_lea.vmem %s602_s4, 32  ;;  %s514_s25 = smov [#allocation2]  }
  0x23   : > { %p416_p3 = scmp.ne.s32.totalorder %s602_s4, %s415_s20  ;;  %s420_s26 = sshll.u32 %s514_s25, 4  ;;  %s421_s26 = int_to_ptr.vmem [resolvable:$false] %s420_s26 }
  0x24   : > { %s422_s27 = scalar_lea.vmem %s421_s26, 64  ;;  %p423_p9 = scmp.lt.s32.totalorder %s602_s4, %s421_s26 }
  0x25   : > { %p418_p6 = pnand %p416_p3, %p402_p5  ;;  %p424_p4 = scmp.lt.s32.totalorder %s422_s27, %s415_s20 }
  0x27   : > { %p419_p11 = pneg %p418_p6  ;;  %p425_p10 = por %p424_p4, %p423_p9 }
  0x29   : > { %p426_p12 = pnand %p425_p10, %p419_p11 }
  0x2b   : > { %429 = shalt.err (!%p426_p12)
}
  0x2c   : > { %345 = dma.hbm_to_vmem [thread:$0]  (!%p606_p0), %s600_s30, 32, %s602_s4, %s139_s6  }
  0x2d   : > { %p715_p1 = scmp.lt.s32.totalorder %s512_s14, 3  ;;  %p716_p2 = scmp.ge.s32.totalorder %s512_s14, 1 }
  0x2f   : > { %p158_p5 = pnand %p716_p2, %p715_p1 }
  0x30   : > { %s642_s28 = sand.u32 (!%p158_p5), 1, %s496_s10  }
  0x31   : > { %161 = sbr.rel (%p158_p5) target bundleno = 83 (0x53), region = 28  ;;  %s329_s29 = sshll.u32 (!%p158_p5), %s642_s28, 1 }
  0x32   : > { %s164_s3 = scalar_lea.sflag (!%p158_p5), [#allocation3], %s642_s28  ;;  %s167_s7 = scalar_lea.vmem (!%p158_p5), [#allocation2], %s329_s29 }
  0x38   : > { %483 = dma.done.wait (%p578_p8), %s164_s3, 32  }
  0x39   : > { %485 = vsyncadd (%p578_p8), %s164_s3, 4294967264  ;;  %v202_v0 = vlaneseq  ;;  %s191_s30 = scalar_lea.vmem [#allocation5], %s329_s29  ;;  %s337_s5 = sshll.u32 %s504_s12, 5  ;;  %v199_v1 = vld [vmem:[%s167_s7] sm:$0x3] }
  0x3a   : > { %s224_s4 = sshll.u32 %s191_s30, 4  ;;  %v200_v2 = vld [vmem:[%s707_s1] sm:$0x3]  ;;  %s659_s21 = scalar_lea.hbm %s708_s2, %s337_s5  ;;  %s654_s4 = int_to_ptr.vmem [resolvable:$true] %s224_s4 }
  0x3b   : > { %vm204_vm0 = vcmp.lt.s32.totalorder %v202_v0, 256  ;;  %v201_v3 = vadd.f32 %v200_v2, %v199_v1  ;;  %s208_s18 = scalar_lea.sflag [#allocation4], %s642_s28  ;;  %s430_s12 = scalar_lea.vmem %s654_s4, 32 }
  0x3c   : > { %p431_p8 = scmp.ne.s32.totalorder %s654_s4, %s430_s12  ;;  %p717_p9 = scmp.ne.s32.totalorder %s712_s22, 0 }
  0x3d   : > { %206 = vst.msk [vmem:[%s191_s30] sm:$0x3] %vm204_vm0, %v201_v3  ;;  %s515_s19 = smov [#allocation5]  }
  0x3e   : > { %p432_p11 = pnand %p431_p8, %p717_p9  ;;  %s434_s20 = sshll.u32 %s515_s19, 4  ;;  %s435_s20 = int_to_ptr.vmem [resolvable:$false] %s434_s20 }
  0x3f   : > { %s436_s25 = scalar_lea.vmem %s435_s20, 64  ;;  %p437_p7 = scmp.lt.s32.totalorder %s654_s4, %s435_s20 }
  0x40   : > { %p433_p0 = pneg %p432_p11  ;;  %p438_p13 = scmp.lt.s32.totalorder %s436_s25, %s430_s12 }
  0x42   : > { %p439_p3 = por %p438_p13, %p437_p7 }
  0x44   : > { %p440_p6 = pnand %p439_p3, %p433_p0 }
  0x46   : > { %443 = shalt.err (!%p440_p6)
}
  0x47   : > { %s444_s26 = scalar_lea.hbm %s659_s21, 32  ;;  %s448_s29 = scalar_lea.hbm %s708_s2, 64 }
  0x48   : > { %p445_p4 = scmp.ne.s32.totalorder %s659_s21, %s444_s26  ;;  %p449_p1 = scmp.lt.u32.totalorder %s659_s21, %s708_s2 }
  0x49   : > { %p450_p2 = scmp.lt.u32.totalorder %s448_s29, %s444_s26  ;;  %p452_p8 = scmp.lt.u32.totalorder %s444_s26, %s659_s21 }
  0x4a   : > { %p446_p10 = pnand %p445_p4, %p717_p9 }
  0x4b   : > { %p451_p5 = por %p450_p2, %p449_p1 }
  0x4c   : > { %p447_p12 = pneg %p446_p10 }
  0x4d   : > { %p453_p11 = por %p452_p8, %p451_p5 }
  0x4f   : > { %p454_p0 = pnand %p453_p11, %p447_p12 }
  0x51   : > { %457 = shalt.err (!%p454_p0)
}
  0x52   : > { %340 = dma.vmem_to_hbm [thread:$0]  (%p717_p9), %s654_s4, 32, %s659_s21, %s208_s18  }
  0x53 PF: > { %s236_s30 = sand.u32 1, %s492_s9   ;;  %p718_p7 = scmp.ne.s32.totalorder %s713_s24, 0 }
  0x54   : > { %p719_p13 = scmp.ge.s32.totalorder %s512_s14, 2  ;;  %s237_s5 = scalar_lea.sflag [#allocation4], %s236_s30 }
  0x56   : > { %p347_p3 = pnand %p719_p13, %p718_p7 }
  0x58   : > { %487 = dma.done.wait (!%p347_p3), %s237_s5, 32  }
  0x59   : > { %489 = vsyncadd (!%p347_p3), %s237_s5, 4294967264  ;;  %s18_s14 = sadd.s32 1, %s512_s14   ;;  %s720_s9 = smov %s496_s10 }
  0x5a   : > { %p15_p6 = scmp.ge.s32.totalorder %s18_s14, 4   ;;  %s721_s10 = smov %s500_s11 }
  0x5b   : > { %s722_s11 = smov %s587_s23  ;;  %s723_s12 = smov %s508_s13 }
  0x5c   : > { %s724_s13 = smov %s726_s17  ;;  %17 = sbr.rel (!%p15_p6) target bundleno = 6 (0x6), region = 76 }
  0x63   :  { %242 = vsyncpa [#allocation3], 1 }
  0x64   :  { %244 = vsyncpa [#allocation3 + $0x1], 1 }
  0x65   :  { %245 = vsyncpa [#allocation4], 1 }
  0x66   :  { %247 = vsyncpa [#allocation4 + $0x1], 1 }

</bundles_post_ra>
